<compile_context>
chip_gen: v6e
topology: v6e:2x2x1
jax: 0.10.0
libtpu: 0.0.40
codegen_flags: <defaults>
</compile_context>

<pallas_src>
import functools

import jax
import jax.numpy as jnp
from jax.experimental import pallas as pl
from jax.experimental.pallas import tpu as pltpu

LEAKY_SLOPE = 0.01  # F.leaky_relu default negative_slope


def _leaky_relu(v):
    return jnp.where(v > 0, v, LEAKY_SLOPE * v)


def _round_up(n, m):
    return ((n + m - 1) // m) * m


def qnetwork_kernel(x_ref, a_ref, wxs_ref, was_ref, bin_ref, w1_ref, b1_ref,
                    wo_ref, bo_ref, q_ref):
    """One batch tile:
       q = leaky(leaky(x@Wxs + a@Was + b_in) @ W1 + b1) @ Wo + bo."""
    mm_dtype = wxs_ref.dtype  # bf16 or f32 matmul operands; f32 accumulation.

    x = x_ref[...].astype(mm_dtype)
    a = a_ref[...].astype(mm_dtype)

    # Layer 1 (fused fc_s + fc_a): two small-K dots produce [h1 | h2] directly
    # (Wxs = [Ws^T | 0], Was = [0 | Wa^T]) -> no in-kernel concat.
    h12 = _leaky_relu(
        jnp.dot(x, wxs_ref[...], preferred_element_type=jnp.float32)
        + jnp.dot(a, was_ref[...], preferred_element_type=jnp.float32)
        + bin_ref[...])

    # Layer 2 (fc_1): (TB, 256) @ (256, 256).
    h = _leaky_relu(
        jnp.dot(h12.astype(mm_dtype), w1_ref[...],
                preferred_element_type=jnp.float32)
        + b1_ref[...])

    # Output head (fc_out, zero-padded to 128 lanes): (TB, 256) @ (256, 128).
    q = (jnp.dot(h.astype(mm_dtype), wo_ref[...],
                 preferred_element_type=jnp.float32)
         + bo_ref[...])
    q_ref[...] = q.astype(q_ref.dtype)


def prepare_qnetwork_params(params, compute_dtype=jnp.bfloat16):
    """One-time prep: transpose / split / pad PyTorch-convention weights.

    params: w_s (128, S), b_s (128,), w_a (128, A), b_a (128,),
            w_1 (256, 256), b_1 (256,), w_out (A, 256), b_out (A,)
    """
    out_dim = params["w_out"].shape[0]

    ws_t = params["w_s"].T.astype(jnp.float32)   # (S, 128)
    wa_t = params["w_a"].T.astype(jnp.float32)   # (A, 128)
    n1 = ws_t.shape[1] + wa_t.shape[1]           # 256

    # w_xs = [Ws^T | 0]  (S, 256);  w_as = [0 | Wa^T]  (A, 256).
    w_xs = jnp.zeros((ws_t.shape[0], n1), jnp.float32).at[:, :ws_t.shape[1]].set(ws_t)
    w_as = jnp.zeros((wa_t.shape[0], n1), jnp.float32).at[:, ws_t.shape[1]:].set(wa_t)
    b_in = jnp.concatenate([params["b_s"], params["b_a"]]).reshape(1, -1)

    w1 = params["w_1"].T.astype(jnp.float32)     # (256, 256)
    b1 = params["b_1"].reshape(1, -1)

    out_pad = _round_up(out_dim, 128)            # lane-dense output head
    wo = jnp.zeros((w1.shape[1], out_pad), jnp.float32)
    wo = wo.at[:, :out_dim].set(params["w_out"].T)
    bo = jnp.zeros((1, out_pad), jnp.float32).at[:, :out_dim].set(params["b_out"])

    return dict(
        w_xs=w_xs.astype(compute_dtype),
        w_as=w_as.astype(compute_dtype),
        b_in=b_in.astype(jnp.float32),
        w1=w1.astype(compute_dtype),
        b1=b1.astype(jnp.float32),
        wo=wo.astype(compute_dtype),
        bo=bo.astype(jnp.float32),
    )


def _choose_batch_tile(batch, mm_itemsize, block_b):
    """Batch tile: multiple of 8, VMEM-guarded, grid >= 2 for large B."""
    # VMEM guard (v5e 16 MiB scoped default is the tightest): f32 operands
    # -> <= 2048 rows/tile, bf16 -> <= 4096 (intermediates stay f32).
    max_tb = 4096 if mm_itemsize <= 2 else 2048
    b8 = _round_up(batch, 8)
    if block_b is not None:
        return max(8, min(_round_up(block_b, 8), max_tb, b8))
    if b8 <= 1024:
        return min(b8, max_tb)          # small batch: a single big tile
    # Large batch: as big as allowed, but keep >= 2 grid steps so the
    # "parallel" axis still shards across v7x's two TensorCores.
    return min(max_tb, _round_up(pl.cdiv(b8, 2), 8))


@functools.partial(jax.jit, static_argnames=("action_dim", "block_b"))
def qnetwork_forward(x, a, prep, *, action_dim, block_b=None):
    """Pallas-backed QNetwork forward. x: (B, S), a: (B, A) -> (B, action_dim)."""
    batch, state_dim = x.shape
    act_in_dim = a.shape[1]
    out_dtype_orig = x.dtype

    mm_dtype = prep["w1"].dtype
    tb = _choose_batch_tile(batch, jnp.dtype(mm_dtype).itemsize, block_b)

    # Only pad when B is not a multiple of 8 AND fits in one tile (<= 7 rows);
    # otherwise the ragged last tile is handled by Pallas' masked edge writes.
    b_eff = batch
    if tb > batch:
        x = jnp.pad(x, ((0, tb - batch), (0, 0)))
        a = jnp.pad(a, ((0, tb - batch), (0, 0)))
        b_eff = tb

    grid = (pl.cdiv(b_eff, tb),)
    n1 = prep["w_xs"].shape[1]          # 256
    n_out = prep["wo"].shape[1]         # 128-padded head width

    # bf16 matmul path -> bf16 output (halves HBM writeback, lane-dense
    # stores kept); f32 path keeps f32 output for exact comparisons.
    out_dtype = jnp.bfloat16 if mm_dtype == jnp.bfloat16 else jnp.float32

    flops = 2 * b_eff * (state_dim * n1 + act_in_dim * n1 + n1 * n1 + n1 * n_out)
    bytes_accessed = (
        b_eff * (state_dim * x.dtype.itemsize + act_in_dim * a.dtype.itemsize)
        + b_eff * n_out * jnp.dtype(out_dtype).itemsize
        + sum(int(v.size) * v.dtype.itemsize for v in prep.values()))

    out = pl.pallas_call(
        qnetwork_kernel,
        out_shape=jax.ShapeDtypeStruct((b_eff, n_out), out_dtype),
        grid=grid,
        in_specs=[
            pl.BlockSpec((tb, state_dim), lambda i: (i, 0)),      # x: tiled
            pl.BlockSpec((tb, act_in_dim), lambda i: (i, 0)),     # a: tiled
            pl.BlockSpec(prep["w_xs"].shape, lambda i: (0, 0)),   # weights:
            pl.BlockSpec(prep["w_as"].shape, lambda i: (0, 0)),   #  VMEM-resident
            pl.BlockSpec(prep["b_in"].shape, lambda i: (0, 0)),
            pl.BlockSpec(prep["w1"].shape, lambda i: (0, 0)),
            pl.BlockSpec(prep["b1"].shape, lambda i: (0, 0)),
            pl.BlockSpec(prep["wo"].shape, lambda i: (0, 0)),
            pl.BlockSpec(prep["bo"].shape, lambda i: (0, 0)),
        ],
        out_specs=pl.BlockSpec((tb, n_out), lambda i: (i, 0)),
        compiler_params=pltpu.CompilerParams(
            dimension_semantics=("parallel",),          # megacore / v7x 2-TC
            vmem_limit_bytes=32 * 1024 * 1024,          # safe on v5e/v6e/v7x
        ),
        cost_estimate=pl.CostEstimate(
            flops=int(flops), transcendentals=0,
            bytes_accessed=int(bytes_accessed)),
    )(x, a, prep["w_xs"], prep["w_as"], prep["b_in"], prep["w1"], prep["b1"],
      prep["wo"], prep["bo"])

    return out[:batch, :action_dim].astype(out_dtype_orig)


def init_qnetwork_params(key, state_dim, action_dim):
    """Deterministic init mimicking nn.Linear (uniform +-1/sqrt(fan_in))."""
    def linear(k, out_f, in_f):
        kw, kb = jax.random.split(k)
        bound = 1.0 / jnp.sqrt(in_f)
        w = jax.random.uniform(kw, (out_f, in_f), jnp.float32, -bound, bound)
        b = jax.random.uniform(kb, (out_f,), jnp.float32, -bound, bound)
        return w, b

    k1, k2, k3, k4 = jax.random.split(key, 4)
    w_s, b_s = linear(k1, 128, state_dim)
    w_a, b_a = linear(k2, 128, action_dim)
    w_1, b_1 = linear(k3, 256, 256)
    w_out, b_out = linear(k4, action_dim, 256)
    return dict(w_s=w_s, b_s=b_s, w_a=w_a, b_a=b_a,
                w_1=w_1, b_1=b_1, w_out=w_out, b_out=b_out)


def qnetwork_reference(x, a, p):
    """Pure-JAX reference of the PyTorch forward."""
    def leaky(v):
        return jnp.where(v > 0, v, LEAKY_SLOPE * v)
    h1 = leaky(x @ p["w_s"].T + p["b_s"])
    h2 = leaky(a @ p["w_a"].T + p["b_a"])
    cat = jnp.concatenate([h1, h2], axis=-1)
    q = leaky(cat @ p["w_1"].T + p["b_1"])
    return q @ p["w_out"].T + p["b_out"]


if __name__ == "__main__":
    state_dim, action_dim = 32, 8

    key = jax.random.PRNGKey(0)
    k_params, k_x1, k_a1, k_x2, k_a2 = jax.random.split(key, 5)

    params = init_qnetwork_params(k_params, state_dim, action_dim)
    prep_f32 = prepare_qnetwork_params(params, jnp.float32)
    prep_bf16 = prepare_qnetwork_params(params, jnp.bfloat16)   # default path

    # Case 1: tiny batch (B=8), f32 matmuls, single tile -> tight match.
    x1 = jax.random.normal(k_x1, (8, state_dim), jnp.float32)
    a1 = jax.random.normal(k_a1, (8, action_dim), jnp.float32)
    q1 = jax.block_until_ready(
        qnetwork_forward(x1, a1, prep_f32, action_dim=action_dim))
    ref1 = qnetwork_reference(x1, a1, params)
    assert q1.shape == (8, action_dim)
    assert jnp.allclose(q1, ref1, atol=1e-5, rtol=1e-5), "f32 mismatch (B=8)"

    # Case 2: B=200 with block_b=64 -> multi-tile grid with a ragged last tile
    # (masked edge writes), still exact f32.
    x2 = jax.random.normal(k_x2, (200, state_dim), jnp.float32)
    a2 = jax.random.normal(k_a2, (200, action_dim), jnp.float32)
    q2 = jax.block_until_ready(
        qnetwork_forward(x2, a2, prep_f32, action_dim=action_dim, block_b=64))
    ref2 = qnetwork_reference(x2, a2, params)
    assert q2.shape == (200, action_dim)
    assert jnp.allclose(q2, ref2, atol=5e-5, rtol=5e-5), "f32 mismatch (B=200)"

    # Case 3: default bf16 matmul operands + bf16 writeback, auto tile.
    q3 = jax.block_until_ready(
        qnetwork_forward(x2, a2, prep_bf16, action_dim=action_dim))
    max_err = float(jnp.max(jnp.abs(q3.astype(jnp.float32) - ref2)))
    assert q3.shape == (200, action_dim)
    assert max_err < 0.15, f"bf16 error too large: {max_err}"

    print("KERNEL_OK")
</pallas_src>

<mosaic_0001>
module attributes {stable_mosaic.version = 11 : i64} {
  func.func @qnetwork_kernel(%arg0: i32, %arg1: memref<8x32xf32, #tpu.memory_space<vmem>>, %arg2: memref<8x8xf32, #tpu.memory_space<vmem>>, %arg3: memref<32x256xf32, #tpu.memory_space<vmem>>, %arg4: memref<8x256xf32, #tpu.memory_space<vmem>>, %arg5: memref<1x256xf32, #tpu.memory_space<vmem>>, %arg6: memref<256x256xf32, #tpu.memory_space<vmem>>, %arg7: memref<1x256xf32, #tpu.memory_space<vmem>>, %arg8: memref<256x128xf32, #tpu.memory_space<vmem>>, %arg9: memref<1x128xf32, #tpu.memory_space<vmem>>, %arg10: memref<8x128xf32, #tpu.memory_space<vmem>>) attributes {dimension_semantics = [#tpu.dimension_semantics<parallel>], iteration_bounds = array<i64: 1>, scalar_prefetch = 0 : i64, scratch_operands = 0 : i64, tpu.core_type = #tpu.core_type<tc>, window_params = [{transform_indices = @transform_0, window_bounds = array<i64: 8, 32>}, {transform_indices = @transform_1, window_bounds = array<i64: 8, 8>}, {pipeline_mode = #tpu.pipeline_mode<synchronous>, transform_indices = @transform_2, window_bounds = array<i64: 32, 256>}, {pipeline_mode = #tpu.pipeline_mode<synchronous>, transform_indices = @transform_3, window_bounds = array<i64: 8, 256>}, {pipeline_mode = #tpu.pipeline_mode<synchronous>, transform_indices = @transform_4, window_bounds = array<i64: 1, 256>}, {pipeline_mode = #tpu.pipeline_mode<synchronous>, transform_indices = @transform_5, window_bounds = array<i64: 256, 256>}, {pipeline_mode = #tpu.pipeline_mode<synchronous>, transform_indices = @transform_6, window_bounds = array<i64: 1, 256>}, {pipeline_mode = #tpu.pipeline_mode<synchronous>, transform_indices = @transform_7, window_bounds = array<i64: 256, 128>}, {pipeline_mode = #tpu.pipeline_mode<synchronous>, transform_indices = @transform_8, window_bounds = array<i64: 1, 128>}, {transform_indices = @transform_9, window_bounds = array<i64: 8, 128>}]} {
    %c0 = arith.constant 0 : index
    %c0_0 = arith.constant 0 : index
    %0 = vector.load %arg1[%c0, %c0_0] : memref<8x32xf32, #tpu.memory_space<vmem>>, vector<8x32xf32>
    %c0_1 = arith.constant 0 : index
    %c0_2 = arith.constant 0 : index
    %1 = vector.load %arg2[%c0_1, %c0_2] : memref<8x8xf32, #tpu.memory_space<vmem>>, vector<8x8xf32>
    %c0_3 = arith.constant 0 : index
    %c0_4 = arith.constant 0 : index
    %2 = vector.load %arg3[%c0_3, %c0_4] : memref<32x256xf32, #tpu.memory_space<vmem>>, vector<32x256xf32>
    %cst = arith.constant dense<0.000000e+00> : vector<8x256xf32>
    %3 = tpu.matmul %0, %2, %cst {dimension_numbers = #tpu.dot_dimension_numbers<[1], [0], [0], [1], [0, 0, 1, 1], [], []>} : vector<8x32xf32>, vector<32x256xf32>, vector<8x256xf32> -> vector<8x256xf32>
    %c0_5 = arith.constant 0 : index
    %c0_6 = arith.constant 0 : index
    %4 = vector.load %arg4[%c0_5, %c0_6] : memref<8x256xf32, #tpu.memory_space<vmem>>, vector<8x256xf32>
    %cst_7 = arith.constant dense<0.000000e+00> : vector<8x256xf32>
    %5 = tpu.matmul %1, %4, %cst_7 {dimension_numbers = #tpu.dot_dimension_numbers<[1], [0], [0], [1], [0, 0, 1, 1], [], []>} : vector<8x8xf32>, vector<8x256xf32>, vector<8x256xf32> -> vector<8x256xf32>
    %6 = arith.addf %3, %5 : vector<8x256xf32>
    %c0_8 = arith.constant 0 : index
    %c0_9 = arith.constant 0 : index
    %7 = vector.load %arg5[%c0_8, %c0_9] : memref<1x256xf32, #tpu.memory_space<vmem>>, vector<1x256xf32>
    %8 = vector.broadcast %7 : vector<1x256xf32> to vector<8x256xf32>
    %9 = arith.addf %6, %8 : vector<8x256xf32>
    %cst_10 = arith.constant 0.000000e+00 : f32
    %10 = vector.broadcast %cst_10 : f32 to vector<8x256xf32>
    %11 = arith.cmpf ogt, %9, %10 : vector<8x256xf32>
    %cst_11 = arith.constant 0.00999999977 : f32
    %12 = vector.broadcast %cst_11 : f32 to vector<8x256xf32>
    %13 = arith.mulf %12, %9 : vector<8x256xf32>
    %14 = arith.select %11, %9, %13 : vector<8x256xi1>, vector<8x256xf32>
    %c0_12 = arith.constant 0 : index
    %c0_13 = arith.constant 0 : index
    %15 = vector.load %arg6[%c0_12, %c0_13] : memref<256x256xf32, #tpu.memory_space<vmem>>, vector<256x256xf32>
    %cst_14 = arith.constant dense<0.000000e+00> : vector<8x256xf32>
    %16 = tpu.matmul %14, %15, %cst_14 {dimension_numbers = #tpu.dot_dimension_numbers<[1], [0], [0], [1], [0, 0, 1, 1], [], []>} : vector<8x256xf32>, vector<256x256xf32>, vector<8x256xf32> -> vector<8x256xf32>
    %c0_15 = arith.constant 0 : index
    %c0_16 = arith.constant 0 : index
    %17 = vector.load %arg7[%c0_15, %c0_16] : memref<1x256xf32, #tpu.memory_space<vmem>>, vector<1x256xf32>
    %18 = vector.broadcast %17 : vector<1x256xf32> to vector<8x256xf32>
    %19 = arith.addf %16, %18 : vector<8x256xf32>
    %cst_17 = arith.constant 0.000000e+00 : f32
    %20 = vector.broadcast %cst_17 : f32 to vector<8x256xf32>
    %21 = arith.cmpf ogt, %19, %20 : vector<8x256xf32>
    %cst_18 = arith.constant 0.00999999977 : f32
    %22 = vector.broadcast %cst_18 : f32 to vector<8x256xf32>
    %23 = arith.mulf %22, %19 : vector<8x256xf32>
    %24 = arith.select %21, %19, %23 : vector<8x256xi1>, vector<8x256xf32>
    %c0_19 = arith.constant 0 : index
    %c0_20 = arith.constant 0 : index
    %25 = vector.load %arg8[%c0_19, %c0_20] : memref<256x128xf32, #tpu.memory_space<vmem>>, vector<256x128xf32>
    %cst_21 = arith.constant dense<0.000000e+00> : vector<8x128xf32>
    %26 = tpu.matmul %24, %25, %cst_21 {dimension_numbers = #tpu.dot_dimension_numbers<[1], [0], [0], [1], [0, 0, 1, 1], [], []>} : vector<8x256xf32>, vector<256x128xf32>, vector<8x128xf32> -> vector<8x128xf32>
    %c0_22 = arith.constant 0 : index
    %c0_23 = arith.constant 0 : index
    %27 = vector.load %arg9[%c0_22, %c0_23] : memref<1x128xf32, #tpu.memory_space<vmem>>, vector<1x128xf32>
    %28 = vector.broadcast %27 : vector<1x128xf32> to vector<8x128xf32>
    %29 = arith.addf %26, %28 : vector<8x128xf32>
    %c0_24 = arith.constant 0 : index
    %c0_25 = arith.constant 0 : index
    %30 = vector.load %arg10[%c0_24, %c0_25] : memref<8x128xf32, #tpu.memory_space<vmem>>, vector<8x128xf32>
    tpu.vector_store %arg10[%c0_24, %c0_25], %29 {strides = array<i32>} : memref<8x128xf32, #tpu.memory_space<vmem>>, vector<8x128xf32>,
    return
  }
  func.func @transform_0(%arg0: i32) -> (i32, i32) {
    %c0_i32 = arith.constant 0 : i32
    %c0_i32_0 = arith.constant 0 : i32
    return %arg0, %c0_i32 : i32, i32
  }
  func.func @transform_1(%arg0: i32) -> (i32, i32) {
    %c0_i32 = arith.constant 0 : i32
    %c0_i32_0 = arith.constant 0 : i32
    return %arg0, %c0_i32 : i32, i32
  }
  func.func @transform_2(%arg0: i32) -> (i32, i32) {
    %c0_i32 = arith.constant 0 : i32
    %c0_i32_0 = arith.constant 0 : i32
    %c0_i32_1 = arith.constant 0 : i32
    return %c0_i32, %c0_i32_0 : i32, i32
  }
  func.func @transform_3(%arg0: i32) -> (i32, i32) {
    %c0_i32 = arith.constant 0 : i32
    %c0_i32_0 = arith.constant 0 : i32
    %c0_i32_1 = arith.constant 0 : i32
    return %c0_i32, %c0_i32_0 : i32, i32
  }
  func.func @transform_4(%arg0: i32) -> (i32, i32) {
    %c0_i32 = arith.constant 0 : i32
    %c0_i32_0 = arith.constant 0 : i32
    %c0_i32_1 = arith.constant 0 : i32
    return %c0_i32, %c0_i32_0 : i32, i32
  }
  func.func @transform_5(%arg0: i32) -> (i32, i32) {
    %c0_i32 = arith.constant 0 : i32
    %c0_i32_0 = arith.constant 0 : i32
    %c0_i32_1 = arith.constant 0 : i32
    return %c0_i32, %c0_i32_0 : i32, i32
  }
  func.func @transform_6(%arg0: i32) -> (i32, i32) {
    %c0_i32 = arith.constant 0 : i32
    %c0_i32_0 = arith.constant 0 : i32
    %c0_i32_1 = arith.constant 0 : i32
    return %c0_i32, %c0_i32_0 : i32, i32
  }
  func.func @transform_7(%arg0: i32) -> (i32, i32) {
    %c0_i32 = arith.constant 0 : i32
    %c0_i32_0 = arith.constant 0 : i32
    %c0_i32_1 = arith.constant 0 : i32
    return %c0_i32, %c0_i32_0 : i32, i32
  }
  func.func @transform_8(%arg0: i32) -> (i32, i32) {
    %c0_i32 = arith.constant 0 : i32
    %c0_i32_0 = arith.constant 0 : i32
    %c0_i32_1 = arith.constant 0 : i32
    return %c0_i32, %c0_i32_0 : i32, i32
  }
  func.func @transform_9(%arg0: i32) -> (i32, i32) {
    %c0_i32 = arith.constant 0 : i32
    %c0_i32_0 = arith.constant 0 : i32
    return %arg0, %c0_i32 : i32, i32
  }
}

</mosaic_0001>

<bundles_post_ra>
// kernel: qnetwork_forward.1
= control target key start
LH: loop header
LB: loop body
LE: loop exit
PB: predicated region body
PF: predicated region fallthrough
CT: control target
= control target key end

     0   :  { %14 = vsyncpa [#allocation3], 0  ;;  %s897_s0 = inlined_call_operand.hbm [shape: f32[8,32], index: 0, kind: input, shape index: {}]   ;;  %s898_s1 = inlined_call_operand.hbm [shape: f32[8,8], index: 1, kind: input, shape index: {}]   ;;  %s899_s2 = inlined_call_operand.hbm [shape: f32[32,256], index: 2, kind: input, shape index: {}]   ;;  %s900_s3 = inlined_call_operand.hbm [shape: f32[8,256], index: 3, kind: input, shape index: {}]   ;;  %s901_s4 = inlined_call_operand.vmem [shape: f32[1,256], index: 4, kind: input, shape index: {}]   ;;  %s902_s5 = inlined_call_operand.hbm [shape: f32[256,256], index: 5, kind: input, shape index: {}]   ;;  %s903_s6 = inlined_call_operand.hbm [shape: f32[1,256], index: 6, kind: input, shape index: {}]   ;;  %s904_s7 = inlined_call_operand.hbm [shape: f32[256,128], index: 7, kind: input, shape index: {}]   ;;  %s905_s8 = inlined_call_operand.vmem [shape: f32[1,128], index: 8, kind: input, shape index: {}]   ;;  %s906_s9 = inlined_call_operand.hbm [shape: f32[8,128], index: 9, kind: output, shape index: {}]  }
   0x1   :  { %15 = vsyncpa [#allocation6], 0 }
   0x2   :  { %16 = vsyncpa [#allocation9], 0 }
   0x3   :  { %17 = vsyncpa [#allocation12], 0 }
   0x4   :  { %18 = vsyncpa [#allocation4], 0  ;;  %s804_s30 = smov [#allocation5]   ;;  %s805_s11 = smov [#allocation8]  }
   0x5   :  { %s35_s10 = sshll.u32 %s804_s30, 4  ;;  %s57_s12 = sshll.u32 %s805_s11, 4  ;;  %s36_s10 = int_to_ptr.vmem [resolvable:$true] %s35_s10  ;;  %s58_s12 = int_to_ptr.vmem [resolvable:$true] %s57_s12 }
   0x6   :  { %s642_s13 = scalar_lea.vmem %s36_s10, 128  ;;  %p647_p1 = scmp.lt.s32.totalorder %s36_s10, %s36_s10 }
   0x7   :  { %p643_p0 = scmp.ne.s32.totalorder %s36_s10, %s642_s13  ;;  %p648_p2 = scmp.lt.s32.totalorder %s642_s13, %s642_s13 }
   0x9   :  { %p649_p3 = por %p648_p2, %p647_p1 }
   0xb   :  { %p650_p4 = pnand %p649_p3, %p643_p0 }
   0xd   :  { %653 = shalt.err (!%p650_p4)
}
   0xe   :  { %38 = dma.hbm_to_vmem [thread:$0]  %s898_s1, 128, %s36_s10, [#allocation6]  }
   0xf   :  { %s662_s16 = scalar_lea.vmem %s58_s12, 256  ;;  %p667_p6 = scmp.lt.s32.totalorder %s58_s12, %s58_s12 }
  0x10   :  { %p663_p5 = scmp.ne.s32.totalorder %s58_s12, %s662_s16  ;;  %p668_p7 = scmp.lt.s32.totalorder %s662_s16, %s662_s16 }
  0x12   :  { %p669_p8 = por %p668_p7, %p667_p6 }
  0x14   :  { %p670_p9 = pnand %p669_p8, %p663_p5 }
  0x16   :  { %673 = shalt.err (!%p670_p9)
}
  0x17   :  { %60 = dma.hbm_to_vmem [thread:$0]  %s900_s3, 256, %s58_s12, [#allocation9]  }
  0x18   :  { %s806_s19 = smov [#allocation11]   ;;  %s807_s21 = smov [#allocation2]  }
  0x19   :  { %s81_s20 = sshll.u32 %s806_s19, 4  ;;  %s25_s22 = sshll.u32 %s807_s21, 4  ;;  %s82_s20 = int_to_ptr.vmem [resolvable:$true] %s81_s20  ;;  %s26_s22 = int_to_ptr.vmem [resolvable:$true] %s25_s22 }
  0x1a   :  { %s682_s23 = scalar_lea.vmem %s82_s20, 32  ;;  %p687_p11 = scmp.lt.s32.totalorder %s82_s20, %s82_s20 }
  0x1b   :  { %p683_p10 = scmp.ne.s32.totalorder %s82_s20, %s682_s23  ;;  %p688_p12 = scmp.lt.s32.totalorder %s682_s23, %s682_s23 }
  0x1d   :  { %p689_p13 = por %p688_p12, %p687_p11 }
  0x1f   :  { %p690_p0 = pnand %p689_p13, %p683_p10 }
  0x21   :  { %693 = shalt.err (!%p690_p0)
}
  0x22   :  { %84 = dma.hbm_to_vmem [thread:$0]  %s903_s6, 32, %s82_s20, [#allocation12]  }
  0x23   :  { %s702_s25 = scalar_lea.vmem %s26_s22, 128  ;;  %p707_p2 = scmp.lt.s32.totalorder %s26_s22, %s26_s22 }
  0x24   :  { %p703_p1 = scmp.ne.s32.totalorder %s26_s22, %s702_s25  ;;  %p708_p3 = scmp.lt.s32.totalorder %s702_s25, %s702_s25 }
  0x26   :  { %p709_p4 = por %p708_p3, %p707_p2 }
  0x28   :  { %p710_p5 = pnand %p709_p4, %p703_p1 }
  0x2a   :  { %713 = shalt.err (!%p710_p5)
}
  0x2b   :  { %28 = dma.hbm_to_vmem [thread:$0]  %s897_s0, 128, %s26_s22, [#allocation3]  }
  0x2c   :  { %s808_s27 = smov [#allocation7]  }
  0x2d   :  { %s44_s28 = sshll.u32 %s808_s27, 4  ;;  %s45_s28 = int_to_ptr.vmem [resolvable:$true] %s44_s28 }
  0x2e   :  { %s722_s29 = scalar_lea.vmem %s45_s28, 1024  ;;  %p727_p7 = scmp.lt.s32.totalorder %s45_s28, %s45_s28 }
  0x2f   :  { %p723_p6 = scmp.ne.s32.totalorder %s45_s28, %s722_s29  ;;  %p728_p8 = scmp.lt.s32.totalorder %s722_s29, %s722_s29 }
  0x31   :  { %p729_p9 = por %p728_p8, %p727_p7 }
  0x33   :  { %p730_p10 = pnand %p729_p9, %p723_p6 }
  0x35   :  { %733 = shalt.err (!%p730_p10)
}
  0x36   :  { %s809_s6 = smov 256   ;;  %s810_s30 = smov 16  }
  0x37   :  { %50 = dma.hbm_to_vmem [thread:$0]  %s899_s2, 1024, %s45_s28, [#allocation6], %s809_s6, %s809_s6, %s810_s30  }
  0x38   :  { %s811_s12 = smov [#allocation10]   ;;  %s812_s0 = smov [#allocation13]  }
  0x39   :  { %s68_s13 = sshll.u32 %s811_s12, 4  ;;  %s90_s14 = sshll.u32 %s812_s0, 4  ;;  %s69_s13 = int_to_ptr.vmem [resolvable:$true] %s68_s13  ;;  %s91_s14 = int_to_ptr.vmem [resolvable:$true] %s90_s14 }
  0x3a   :  { %s742_s15 = scalar_lea.vmem %s69_s13, 8192  ;;  %p747_p12 = scmp.lt.s32.totalorder %s69_s13, %s69_s13 }
  0x3b   :  { %p743_p11 = scmp.ne.s32.totalorder %s69_s13, %s742_s15  ;;  %p748_p13 = scmp.lt.s32.totalorder %s742_s15, %s742_s15 }
  0x3d   :  { %p749_p0 = por %p748_p13, %p747_p12 }
  0x3f   :  { %p750_p1 = pnand %p749_p0, %p743_p11 }
  0x41   :  { %753 = shalt.err (!%p750_p1)
}
  0x42   :  { %74 = dma.hbm_to_vmem [thread:$0]  %s902_s5, 8192, %s69_s13, [#allocation9], %s809_s6, %s809_s6, %s810_s30  }
  0x43   :  { %s762_s18 = scalar_lea.vmem %s91_s14, 4096  ;;  %p767_p3 = scmp.lt.s32.totalorder %s91_s14, %s91_s14 }
  0x44   :  { %p763_p2 = scmp.ne.s32.totalorder %s91_s14, %s762_s18  ;;  %p768_p4 = scmp.lt.s32.totalorder %s762_s18, %s762_s18 }
  0x46   :  { %p769_p5 = por %p768_p4, %p767_p3 }
  0x48   :  { %p770_p6 = pnand %p769_p5, %p763_p2 }
  0x4a   :  { %773 = shalt.err (!%p770_p6)
}
  0x4b   :  { %s813_s2 = smov 128   ;;  %s814_s19 = smov 8  }
  0x4c   :  { %96 = dma.hbm_to_vmem [thread:$0]  %s904_s7, 4096, %s91_s14, [#allocation12], %s813_s2, %s813_s2, %s814_s19  }
  0x4d   :  { %794 = dma.done.wait [#allocation3], 128  }
  0x4e   :  { %795 = vsyncadd [#allocation3], 4294967168 }
  0x4f   :  { %796 = dma.done.wait [#allocation6], 1152  }
  0x50   :  { %797 = vsyncadd [#allocation6], 4294966144 }
  0x51   :  { %798 = dma.done.wait [#allocation9], 8448  }
  0x52   :  { %799 = vsyncadd [#allocation9], 4294958848 }
  0x53   :  { %800 = dma.done.wait [#allocation12], 4128  }
  0x54   :  { %801 = vsyncadd [#allocation12], 4294963168  ;;  %v815_v0 = vmov 0.0   ;;  %v131_v1 = vld [vmem:[#allocation8 + $0x8] sm:$0xff]  ;;  %v130_v2 = vld [vmem:[#allocation8] sm:$0xff]  ;;  %vm132_vm0 = vcmask 64512  }
  0x55   :  { %200 = vmatprep.mubr.f32.mxu1 %v815_v0  ;;  %v121_v3 = vld [vmem:[#allocation5] sm:$0xff]  ;;  %166 = vmatprep.subr.mxu1 %v131_v1  ;;  %v128_v5 = vld [vmem:[#allocation7 + $0x30] sm:$0xff]  ;;  %v127_v6 = vld [vmem:[#allocation7 + $0x28] sm:$0xff]  ;;  %vm207_vm1 = vcmask 261120   ;;  %s816_s23 = smov [#allocation14]  }
  0x56   :  { %v129_v4 = vld [vmem:[#allocation7 + $0x38] sm:$0xff]  ;;  %167 = vmatpush1.msra.mxu1 %v130_v2  ;;  %v126_v7 = vld [vmem:[#allocation7 + $0x20] sm:$0xff]  ;;  %v333_v9 = vld [vmem:[#allocation10 + $0xf8] sm:$0xff]  ;;  %s571_s1 = sshll.u32 %s816_s23, 4  ;;  %s572_s1 = int_to_ptr.vmem [resolvable:$true] %s571_s1 }
  0x57   :  { %583 = vmatmul.mubr.msk.f32.vlgmr.msra.gmra.mxu1 %vm132_vm0, %v121_v3  ;;  %235 = vmatprep.subr.mxu1 %v129_v4  ;;  %v125_v8 = vld [vmem:[#allocation7 + $0x18] sm:$0xff]  ;;  %v332_v10 = vld [vmem:[#allocation10 + $0xf0] sm:$0xff]  ;;  %v124_v12 = vld [vmem:[#allocation7 + $0x10] sm:$0xff]  ;;  %s774_s24 = scalar_lea.vmem %s572_s1, 128  ;;  %p779_p8 = scmp.lt.s32.totalorder %s572_s1, %s572_s1 }
  0x58   :  { %236 = vmatpush1.msra.mxu1 %v128_v5  ;;  %275 = vmatprep.mubr.f32.mxu1 %v815_v0  ;;  %v331_v11 = vld [vmem:[#allocation10 + $0xe8] sm:$0xff]  ;;  %v330_v13 = vld [vmem:[#allocation10 + $0xe0] sm:$0xff]  ;;  %v123_v14 = vld [vmem:[#allocation7 + $0x8] sm:$0xff]  ;;  %p775_p7 = scmp.ne.s32.totalorder %s572_s1, %s774_s24  ;;  %p780_p9 = scmp.lt.s32.totalorder %s774_s24, %s774_s24 }
  0x59   :  { %237 = vmatprep.subr.mxu1 %v127_v6  ;;  %378 = vmatprep.subr.mxu0 %v333_v9  ;;  %v329_v15 = vld [vmem:[#allocation10 + $0xd8] sm:$0xff]  ;;  %v122_v16 = vld [vmem:[#allocation7] sm:$0xff]  ;;  %v120_v18 = vld [vmem:[#allocation2] sm:$0xff] }
  0x5a   :  { %238 = vmatpush1.msra.mxu1 %v126_v7  ;;  %379 = vmatpush1.msra.mxu0 %v332_v10  ;;  %v328_v17 = vld [vmem:[#allocation10 + $0xd0] sm:$0xff]  ;;  %v327_v19 = vld [vmem:[#allocation10 + $0xc8] sm:$0xff]  ;;  %v326_v20 = vld [vmem:[#allocation10 + $0xc0] sm:$0xff]  ;;  %p781_p10 = por %p780_p9, %p779_p8 }
  0x5b   :  { %239 = vmatprep.subr.mxu1 %v125_v8  ;;  %380 = vmatprep.subr.mxu0 %v331_v11  ;;  %v325_v21 = vld [vmem:[#allocation10 + $0xb8] sm:$0xff]  ;;  %v324_v22 = vld [vmem:[#allocation10 + $0xb0] sm:$0xff]  ;;  %v323_v23 = vld [vmem:[#allocation10 + $0xa8] sm:$0xff] }
  0x5c   :  { %240 = vmatpush1.msra.mxu1 %v124_v12  ;;  %381 = vmatpush1.msra.mxu0 %v330_v13  ;;  %v322_v24 = vld [vmem:[#allocation10 + $0xa0] sm:$0xff]  ;;  %v321_v25 = vld [vmem:[#allocation10 + $0x98] sm:$0xff]  ;;  %v320_v26 = vld [vmem:[#allocation10 + $0x90] sm:$0xff]  ;;  %p782_p11 = pnand %p781_p10, %p775_p7 }
  0x5d   :  { %241 = vmatprep.subr.mxu1 %v123_v14  ;;  %382 = vmatprep.subr.mxu0 %v329_v15  ;;  %v319_v27 = vld [vmem:[#allocation10 + $0x88] sm:$0xff]  ;;  %v318_v28 = vld [vmem:[#allocation10 + $0x80] sm:$0xff]  ;;  %v317_v29 = vld [vmem:[#allocation10 + $0x78] sm:$0xff] }
  0x5e   :  { %242 = vmatpush1.msra.mxu1 %v122_v16  ;;  %383 = vmatpush1.msra.mxu0 %v328_v17  ;;  %v316_v30 = vld [vmem:[#allocation10 + $0x70] sm:$0xff]  ;;  %v315_v31 = vld [vmem:[#allocation10 + $0x68] sm:$0xff]  ;;  %v314_v32 = vld [vmem:[#allocation10 + $0x60] sm:$0xff] }
  0x5f   :  { %584 = vmatmul.mubr.msk.f32.vlgmr.msra.gmra.mxu1 %vm207_vm1, %v120_v18  ;;  %384 = vmatprep.subr.mxu0 %v327_v19  ;;  %v313_v33 = vld [vmem:[#allocation10 + $0x58] sm:$0xff]  ;;  %v312_v34 = vld [vmem:[#allocation10 + $0x50] sm:$0xff]  ;;  %v311_v35 = vld [vmem:[#allocation10 + $0x48] sm:$0xff] }
  0x60   :  { %385 = vmatpush1.msra.mxu0 %v326_v20  ;;  %v310_v36 = vld [vmem:[#allocation10 + $0x40] sm:$0xff]  ;;  %v309_v37 = vld [vmem:[#allocation10 + $0x38] sm:$0xff]  ;;  %v308_v38 = vld [vmem:[#allocation10 + $0x30] sm:$0xff] }
  0x61   :  { %386 = vmatprep.subr.mxu0 %v325_v21  ;;  %v307_v39 = vld [vmem:[#allocation10 + $0x28] sm:$0xff]  ;;  %v306_v40 = vld [vmem:[#allocation10 + $0x20] sm:$0xff]  ;;  %v305_v41 = vld [vmem:[#allocation10 + $0x18] sm:$0xff] }
  0x62   :  { %387 = vmatpush1.msra.mxu0 %v324_v22  ;;  %v304_v42 = vld [vmem:[#allocation10 + $0x10] sm:$0xff]  ;;  %v303_v43 = vld [vmem:[#allocation10 + $0x8] sm:$0xff]  ;;  %v302_v44 = vld [vmem:[#allocation10] sm:$0xff] }
  0x63   :  { %388 = vmatprep.subr.mxu0 %v323_v23  ;;  %v365_v45 = vld [vmem:[#allocation10 + $0x1f8] sm:$0xff]  ;;  %v364_v46 = vld [vmem:[#allocation10 + $0x1f0] sm:$0xff]  ;;  %v363_v47 = vld [vmem:[#allocation10 + $0x1e8] sm:$0xff] }
  0x64   :  { %389 = vmatpush1.msra.mxu0 %v322_v24  ;;  %v362_v48 = vld [vmem:[#allocation10 + $0x1e0] sm:$0xff]  ;;  %v361_v49 = vld [vmem:[#allocation10 + $0x1d8] sm:$0xff]  ;;  %v360_v50 = vld [vmem:[#allocation10 + $0x1d0] sm:$0xff] }
  0x65   :  { %390 = vmatprep.subr.mxu0 %v321_v25  ;;  %v359_v51 = vld [vmem:[#allocation10 + $0x1c8] sm:$0xff]  ;;  %v358_v52 = vld [vmem:[#allocation10 + $0x1c0] sm:$0xff]  ;;  %v357_v53 = vld [vmem:[#allocation10 + $0x1b8] sm:$0xff] }
  0x66   :  { %391 = vmatpush1.msra.mxu0 %v320_v26  ;;  %v356_v54 = vld [vmem:[#allocation10 + $0x1b0] sm:$0xff]  ;;  %v355_v55 = vld [vmem:[#allocation10 + $0x1a8] sm:$0xff]  ;;  %v354_v56 = vld [vmem:[#allocation10 + $0x1a0] sm:$0xff] }
  0x67   :  { %392 = vmatprep.subr.mxu0 %v319_v27  ;;  %v353_v57 = vld [vmem:[#allocation10 + $0x198] sm:$0xff]  ;;  %v352_v58 = vld [vmem:[#allocation10 + $0x190] sm:$0xff]  ;;  %v351_v59 = vld [vmem:[#allocation10 + $0x188] sm:$0xff] }
  0x68   :  { %393 = vmatpush1.msra.mxu0 %v318_v28  ;;  %v350_v60 = vld [vmem:[#allocation10 + $0x180] sm:$0xff]  ;;  %v349_v61 = vld [vmem:[#allocation10 + $0x178] sm:$0xff]  ;;  %v348_v62 = vld [vmem:[#allocation10 + $0x170] sm:$0xff] }
  0x69   :  { %394 = vmatprep.subr.mxu0 %v317_v29  ;;  %v347_v63 = vld [vmem:[#allocation10 + $0x168] sm:$0xff]  ;;  %v346_v0 = vld [vmem:[#allocation10 + $0x160] sm:$0xff]  ;;  %v345_v1 = vld [vmem:[#allocation10 + $0x158] sm:$0xff] }
  0x6a   :  { %395 = vmatpush1.msra.mxu0 %v316_v30  ;;  %v344_v2 = vld [vmem:[#allocation10 + $0x150] sm:$0xff]  ;;  %v343_v3 = vld [vmem:[#allocation10 + $0x148] sm:$0xff]  ;;  %v342_v4 = vld [vmem:[#allocation10 + $0x140] sm:$0xff] }
  0x6b   :  { %396 = vmatprep.subr.mxu0 %v315_v31  ;;  %v341_v5 = vld [vmem:[#allocation10 + $0x138] sm:$0xff]  ;;  %v340_v6 = vld [vmem:[#allocation10 + $0x130] sm:$0xff]  ;;  %v339_v7 = vld [vmem:[#allocation10 + $0x128] sm:$0xff] }
  0x6c   :  { %397 = vmatpush1.msra.mxu0 %v314_v32  ;;  %v338_v8 = vld [vmem:[#allocation10 + $0x120] sm:$0xff]  ;;  %v337_v9 = vld [vmem:[#allocation10 + $0x118] sm:$0xff]  ;;  %v336_v10 = vld [vmem:[#allocation10 + $0x110] sm:$0xff] }
  0x6d   :  { %398 = vmatprep.subr.mxu0 %v313_v33  ;;  %v335_v11 = vld [vmem:[#allocation10 + $0x108] sm:$0xff]  ;;  %v334_v12 = vld [vmem:[#allocation10 + $0x100] sm:$0xff]  ;;  %v485_v15 = vld [vmem:[#allocation13 + $0xf0] sm:$0xff] }
  0x6e   :  { %399 = vmatpush1.msra.mxu0 %v312_v34  ;;  %v486_v13 = vld [vmem:[#allocation13 + $0xf8] sm:$0xff]  ;;  %v469_v16 = vld [vmem:[#allocation13 + $0x70] sm:$0xff]  ;;  %v484_v17 = vld [vmem:[#allocation13 + $0xe8] sm:$0xff] }
  0x6f   :  { %400 = vmatprep.subr.mxu0 %v311_v35  ;;  %v470_v14 = vld [vmem:[#allocation13 + $0x78] sm:$0xff]  ;;  %586 = vmatprep.subr.mxu1 %v486_v13  ;;  %v468_v18 = vld [vmem:[#allocation13 + $0x68] sm:$0xff]  ;;  %v483_v19 = vld [vmem:[#allocation13 + $0xe0] sm:$0xff] }
  0x70   :  { %401 = vmatpush1.msra.mxu0 %v310_v36  ;;  %587 = vmatpush3.msra.mxu1 %v470_v14  ;;  %v467_v20 = vld [vmem:[#allocation13 + $0x60] sm:$0xff]  ;;  %v482_v21 = vld [vmem:[#allocation13 + $0xd8] sm:$0xff]  ;;  %v481_v23 = vld [vmem:[#allocation13 + $0xd0] sm:$0xff]  ;;  %v284_v36 = vlaneseq }
  0x71   :  { %402 = vmatprep.subr.mxu0 %v309_v37  ;;  %588 = vmatprep.subr.mxu1 %v485_v15  ;;  %v466_v22 = vld [vmem:[#allocation13 + $0x58] sm:$0xff]  ;;  %v465_v24 = vld [vmem:[#allocation13 + $0x50] sm:$0xff]  ;;  %v480_v25 = vld [vmem:[#allocation13 + $0xc8] sm:$0xff] }
  0x72   :  { %403 = vmatpush1.msra.mxu0 %v308_v38  ;;  %589 = vmatpush3.msra.mxu1 %v469_v16  ;;  %v464_v26 = vld [vmem:[#allocation13 + $0x48] sm:$0xff]  ;;  %v479_v27 = vld [vmem:[#allocation13 + $0xc0] sm:$0xff]  ;;  %v478_v29 = vld [vmem:[#allocation13 + $0xb8] sm:$0xff]  ;;  %v285_v37 = vshrl.u32 %v284_v36, 7 }
  0x73   :  { %404 = vmatprep.subr.mxu0 %v307_v39  ;;  %590 = vmatprep.subr.mxu1 %v484_v17  ;;  %v463_v28 = vld [vmem:[#allocation13 + $0x40] sm:$0xff]  ;;  %v462_v30 = vld [vmem:[#allocation13 + $0x38] sm:$0xff]  ;;  %v477_v31 = vld [vmem:[#allocation13 + $0xb0] sm:$0xff] }
  0x74   :  { %405 = vmatpush1.msra.mxu0 %v306_v40  ;;  %591 = vmatpush3.msra.mxu1 %v468_v18  ;;  %v461_v32 = vld [vmem:[#allocation13 + $0x30] sm:$0xff]  ;;  %v476_v33 = vld [vmem:[#allocation13 + $0xa8] sm:$0xff]  ;;  %v475_v35 = vld [vmem:[#allocation13 + $0xa0] sm:$0xff]  ;;  %v286_v39 = vsub.s32 0, %v285_v37 }
  0x75   :  { %406 = vmatprep.subr.mxu0 %v305_v41  ;;  %592 = vmatprep.subr.mxu1 %v483_v19  ;;  %v460_v34 = vld [vmem:[#allocation13 + $0x28] sm:$0xff]  ;;  %v282_v40 = vld [vmem:[%s901_s4] sm:$0x3]  ;;  %v290_v41 = vsub.s32 1, %v285_v37 }
  0x76   :  { %407 = vmatpush1.msra.mxu0 %v304_v42  ;;  %593 = vmatpush3.msra.mxu1 %v467_v20 }
  0x77   :  { %408 = vmatprep.subr.mxu0 %v303_v43  ;;  %594 = vmatprep.subr.mxu1 %v482_v21  ;;  %v287_v43 = vrot.slane %v282_v40, %v286_v39 }
  0x78   :  { %409 = vmatpush1.msra.mxu0 %v302_v44  ;;  %595 = vmatpush3.msra.mxu1 %v466_v22 }
  0x79   :  { %410 = vmatprep.subr.mxu0 %v365_v45  ;;  %596 = vmatprep.subr.mxu1 %v481_v23 }
  0x7a   :  { %411 = vmatpush2.msra.mxu0 %v364_v46  ;;  %597 = vmatpush3.msra.mxu1 %v465_v24  ;;  %v291_v46 = vrot.slane %v282_v40, %v290_v41 }
  0x7b   :  { %412 = vmatprep.subr.mxu0 %v363_v47  ;;  %598 = vmatprep.subr.mxu1 %v480_v25 }
  0x7c   :  { %413 = vmatpush2.msra.mxu0 %v362_v48  ;;  %599 = vmatpush3.msra.mxu1 %v464_v26 }
  0x7d   :  { %414 = vmatprep.subr.mxu0 %v361_v49  ;;  %600 = vmatprep.subr.mxu1 %v479_v27 }
  0x7e   :  { %415 = vmatpush2.msra.mxu0 %v360_v50  ;;  %601 = vmatpush3.msra.mxu1 %v463_v28 }
  0x7f   :  { %416 = vmatprep.subr.mxu0 %v359_v51  ;;  %602 = vmatprep.subr.mxu1 %v478_v29 }
  0x80   :  { %417 = vmatpush2.msra.mxu0 %v358_v52  ;;  %603 = vmatpush3.msra.mxu1 %v462_v30 }
  0x81   :  { %418 = vmatprep.subr.mxu0 %v357_v53  ;;  %604 = vmatprep.subr.mxu1 %v477_v31 }
  0x82   :  { %419 = vmatpush2.msra.mxu0 %v356_v54  ;;  %605 = vmatpush3.msra.mxu1 %v461_v32 }
  0x83   :  { %420 = vmatprep.subr.mxu0 %v355_v55  ;;  %606 = vmatprep.subr.mxu1 %v476_v33  ;;  %v459_v55 = vld [vmem:[#allocation13 + $0x20] sm:$0xff] }
  0x84   :  { %421 = vmatpush2.msra.mxu0 %v354_v56  ;;  %607 = vmatpush3.msra.mxu1 %v460_v34  ;;  %v474_v56 = vld [vmem:[#allocation13 + $0x98] sm:$0xff] }
  0x85   :  { %422 = vmatprep.subr.mxu0 %v353_v57  ;;  %608 = vmatprep.subr.mxu1 %v475_v35  ;;  %v458_v57 = vld [vmem:[#allocation13 + $0x18] sm:$0xff] }
  0x86   :  { %423 = vmatpush2.msra.mxu0 %v352_v58  ;;  %609 = vmatpush3.msra.mxu1 %v459_v55  ;;  %v473_v58 = vld [vmem:[#allocation13 + $0x90] sm:$0xff] }
  0x87   :  { %424 = vmatprep.subr.mxu0 %v351_v59  ;;  %610 = vmatprep.subr.mxu1 %v474_v56  ;;  %v457_v59 = vld [vmem:[#allocation13 + $0x10] sm:$0xff] }
  0x88   :  { %425 = vmatpush2.msra.mxu0 %v350_v60  ;;  %611 = vmatpush3.msra.mxu1 %v458_v57  ;;  %v472_v60 = vld [vmem:[#allocation13 + $0x88] sm:$0xff] }
  0x89   :  { %426 = vmatprep.subr.mxu0 %v349_v61  ;;  %612 = vmatprep.subr.mxu1 %v473_v58  ;;  %v456_v61 = vld [vmem:[#allocation13 + $0x8] sm:$0xff] }
  0x8a   :  { %427 = vmatpush2.msra.mxu0 %v348_v62  ;;  %613 = vmatpush3.msra.mxu1 %v457_v59  ;;  %v471_v62 = vld [vmem:[#allocation13 + $0x80] sm:$0xff] }
  0x8b   :  { %428 = vmatprep.subr.mxu0 %v347_v63  ;;  %614 = vmatprep.subr.mxu1 %v472_v60  ;;  %v455_v63 = vld [vmem:[#allocation13] sm:$0xff] }
  0x8c   :  { %429 = vmatpush2.msra.mxu0 %v346_v0  ;;  %615 = vmatpush3.msra.mxu1 %v456_v61  ;;  %v366_v0 = vld [vmem:[#allocation11] sm:$0x3] }
  0x8d   :  { %430 = vmatprep.subr.mxu0 %v345_v1  ;;  %616 = vmatprep.subr.mxu1 %v471_v62  ;;  %v371_v1 = vrot.slane %v366_v0, %v286_v39 }
  0x8e   :  { %431 = vmatpush2.msra.mxu0 %v344_v2  ;;  %617 = vmatpush3.msra.mxu1 %v455_v63  ;;  %v375_v2 = vrot.slane %v366_v0, %v290_v41 }
  0x8f   :  { %432 = vmatprep.subr.mxu0 %v343_v3 }
  0x90   :  { %433 = vmatpush2.msra.mxu0 %v342_v4 }
  0x91   :  { %434 = vmatprep.subr.mxu0 %v341_v5 }
  0x92   :  { %435 = vmatpush2.msra.mxu0 %v340_v6 }
  0x93   :  { %436 = vmatprep.subr.mxu0 %v339_v7 }
  0x94   :  { %437 = vmatpush2.msra.mxu0 %v338_v8 }
  0x95   :  { %438 = vmatprep.subr.mxu0 %v337_v9 }
  0x96   :  { %439 = vmatpush2.msra.mxu0 %v336_v10 }
  0x97   :  { %440 = vmatprep.subr.mxu0 %v335_v11 }
  0x98   :  { %441 = vmatpush2.msra.mxu0 %v334_v12  ;;  %v585_v12 = vld [vmem:[%s905_s8] ss:$0 sm:$0xff] }
 0x117   :  { %v202_v38 = vpop.f32.mrf.mxu1 }
 0x119   :  { %v204_v42 = vpop.f32.mrf.mxu1 }
 0x11f   :  { %v277_v44 = vpop.f32.mrf.mxu1 }
 0x120   :  { %v278_v45 = vadd.f32 %v277_v44, %v202_v38 }
 0x121   :  { %v279_v47 = vpop.f32.mrf.mxu1 }
 0x122   :  { %v294_v48 = vadd.f32 %v287_v43, %v278_v45  ;;  %v280_v49 = vadd.f32 %v279_v47, %v204_v42 }
 0x124   :  { %v295_v50 = vadd.f32 %v291_v46, %v280_v49  ;;  %v298_v51 = vmul.f32 0.01, %v294_v48  ;;  %vm296_vm3 = vcmp.gt.f32.partialorder %v294_v48, 0.0 }
 0x126   :  { %vm297_vm2 = vcmp.gt.f32.partialorder %v295_v50, 0.0  ;;  %v299_v52 = vmul.f32 0.01, %v295_v50  ;;  %v300_v54 = vsel %vm296_vm3, %v294_v48, %v298_v51 }
 0x128   :  { %v301_v53 = vsel %vm297_vm2, %v295_v50, %v299_v52 }
 0x129   :  { %442 = vmatprep.mubr.f32.mxu0 %v301_v53 }
 0x12a   :  { %443 = vmatmul.mubr.f32.vlgmr.msra.gmra.mxu0 %v300_v54 }
 0x1ea   :  { %v444_v3 = vpop.f32.mrf.mxu0 }
 0x1eb   :  { %v445_v4 = vadd.f32 %v444_v3, %v371_v1 }
 0x1ec   :  { %v446_v5 = vpop.f32.mrf.mxu0 }
 0x1ed   :  { %v447_v6 = vadd.f32 %v446_v5, %v375_v2  ;;  %v451_v7 = vmul.f32 0.01, %v445_v4  ;;  %vm449_vm4 = vcmp.gt.f32.partialorder %v445_v4, 0.0 }
 0x1ef   :  { %v452_v8 = vmul.f32 0.01, %v447_v6  ;;  %vm450_vm5 = vcmp.gt.f32.partialorder %v447_v6, 0.0  ;;  %v453_v10 = vsel %vm449_vm4, %v445_v4, %v451_v7 }
 0x1f1   :  { %v454_v9 = vsel %vm450_vm5, %v447_v6, %v452_v8 }
 0x1f2   :  { %558 = vmatprep.mubr.f32.mxu1 %v454_v9 }
 0x1f3   :  { %559 = vmatmul.mubr.f32.vlgmr.msra.gmra.mxu1 %v453_v10 }
 0x2b3   :  { %v618_v11 = vpop.f32.mrf.mxu1 }
 0x2b5   :  { %v619_v13 = vpop.f32.mrf.mxu1 }
 0x2b6   :  { %v620_v14 = vadd.f32 %v619_v13, %v618_v11 }
 0x2b8   :  { %v561_v15 = vadd.f32 %v620_v14, %v585_v12 }
 0x2ba   :  { %564 = vst [vmem:[#allocation14] sm:$0xff] %v561_v15 }
 0x2bb   :  { %785 = shalt.err (!%p782_p11)
}
 0x2bc   :  { %574 = dma.vmem_to_hbm [thread:$0]  %s572_s1, 128, %s906_s9, [#allocation4]  }
 0x2bd   :  { %802 = dma.done.wait [#allocation4], 128  }
 0x2be   :  { %803 = vsyncadd [#allocation4], 4294967168 }
 0x2bf   :  { %578 = vsyncpa [#allocation3], 1 }
 0x2c0   :  { %579 = vsyncpa [#allocation6], 1 }
 0x2c1   :  { %580 = vsyncpa [#allocation9], 1 }
 0x2c2   :  { %581 = vsyncpa [#allocation12], 1 }
 0x2c3   :  { %582 = vsyncpa [#allocation4], 1 }

</bundles_post_ra>
